<compile_context>
chip_gen: v5e
topology: v5e:2x2
jax: 0.10.0
libtpu: 0.0.40
codegen_flags: <defaults>
</compile_context>

<pallas_src>
import functools

import jax
import jax.numpy as jnp
from jax.experimental import pallas as pl
from jax.experimental.pallas import tpu as pltpu


def _round_up(x, m):
    return ((x + m - 1) // m) * m


# ----------------------------------------------------------------------------
# Wrapper-side constants: tap shifts + boundary masks (hoisted out of kernel)
# ----------------------------------------------------------------------------
def _make_taps_and_masks(H, W, K):
    """Static flat shifts (tap order t = kh*K + kw) and (KK, 1, HW) f32 masks."""
    HW = H * W
    pad = K // 2
    p = jnp.arange(HW, dtype=jnp.int32)
    h = p // W
    w = p % W
    shifts = []
    rows = []
    for kh in range(K):
        for kw in range(K):
            dh, dw = kh - pad, kw - pad
            shifts.append(dh * W + dw)
            m = jnp.ones((HW,), jnp.bool_)
            if dh > 0:
                m = m & (h < H - dh)
            if dh < 0:
                m = m & (h >= -dh)
            if dw > 0:
                m = m & (w < W - dw)
            if dw < 0:
                m = m & (w >= -dw)
            rows.append(m)
    masks = jnp.stack(rows).astype(jnp.float32).reshape(K * K, 1, HW)
    return tuple(shifts), masks


# ----------------------------------------------------------------------------
# Fused kernel: conv1 -> ReLU -> conv2 (+ per-image BN partial stats)
# ----------------------------------------------------------------------------
def fused_postconv_kernel(x_ref, m_ref, w1_ref, b1_ref, w2_ref, b2_ref,
                          y_ref, stats_ref, stage_ref, *, shifts, hw, nb):
    """One grid step = `nb` images.

    x_ref:     (nb, Cp, HW)       f32
    m_ref:     (KK, 1, HW)        f32 boundary masks (resident, constant block)
    w1_ref:    (Cp, KK*Cp)        mxu_dtype (tap-major flattened weights)
    b1_ref:    (Cp, 1)            f32
    w2_ref:    (Cout_p, KK*Cp)    mxu_dtype
    b2_ref:    (Cout_p, 1)        f32
    y_ref:     (nb, Cout_p, HW)   f32 (pre-BN conv2 output)
    stats_ref: (nb, Cout_p, 2)    f32 per-image (sum, centered M2)
    stage_ref: (KK*Cp, HW)        mxu_dtype scratch (im2col operand)
    """
    cp = x_ref.shape[1]
    inv_hw = 1.0 / hw

    # Weights resident in vregs for the whole step.
    w1 = w1_ref[...]
    w2 = w2_ref[...]
    b1 = b1_ref[...]
    b2 = b2_ref[...]

    def stage(a):
        # a: (C, HW) f32.  Write KK shifted + zero-padded copies into stage_ref.
        for t, s in enumerate(shifts):
            if s == 0:                                  # center tap: identity, no mask
                sh = a
            else:
                sh = pltpu.roll(a, shift=(-s) % hw, axis=1)   # XLU rotation
                sh = sh * m_ref[t]                            # zero-padding mask (1, HW)
            stage_ref[t * cp:(t + 1) * cp, :] = sh.astype(stage_ref.dtype)

    for i in range(nb):                                 # static unroll, nb is small
        x_i = x_ref[i]                                  # (Cp, HW)

        # conv1 + ReLU: one depth-(KK*Cp) matmul; activation never leaves VMEM.
        stage(x_i)
        h1 = jnp.dot(w1, stage_ref[...], preferred_element_type=jnp.float32) + b1
        h1 = jnp.maximum(h1, 0.0)

        # conv2: second im2col pass reuses the same scratch & masks.
        stage(h1)
        y = jnp.dot(w2, stage_ref[...], preferred_element_type=jnp.float32) + b2
        y_ref[i] = y.astype(y_ref.dtype)

        # Per-image centered partial statistics (Chan-combined in the wrapper):
        # keeps the batch grid axis parallel and avoids E[x^2]-E[x]^2 cancellation.
        s = jnp.sum(y, axis=1, keepdims=True)           # (Cout_p, 1)
        d = y - s * inv_hw
        m2 = jnp.sum(d * d, axis=1, keepdims=True)      # (Cout_p, 1)
        stats_ref[i] = jnp.concatenate([s, m2], axis=1)


# ----------------------------------------------------------------------------
# PostConv forward (NCHW interface, like PyTorch)
# ----------------------------------------------------------------------------
def post_conv_forward(x_nchw, params, *, mxu_dtype=jnp.float32):
    """x_nchw: (N, Cin, H, W) f32 -> (N, Cout, H, W) f32.

    mxu_dtype=jnp.bfloat16 feeds the MXU in bf16 (full-rate on v6e/v7x, halves
    staging traffic) with f32 accumulation; default f32 matches PyTorch exactly.
    """
    N, Cin, H, W = x_nchw.shape
    HW = H * W
    w1, b1, w2, b2 = params["w1"], params["b1"], params["w2"], params["b2"]
    KK, Cmid, _ = w1.shape
    Cout = w2.shape[1]
    K = int(round(KK ** 0.5))

    # Channel padding to the sublane granule (full vregs / full MXU pushes).
    gran = 8 if mxu_dtype == jnp.float32 else 16
    Cp = _round_up(max(Cin, Cmid), gran)     # shared padded width for conv1 in / conv1 out
    Cout_p = _round_up(Cout, gran)

    # Flatten spatial onto the lane axis: (N,C,H,W) -> (N,C,H*W) is a free
    # row-major reshape; pad channels with zeros.
    x_flat = x_nchw.reshape(N, Cin, HW)
    x_pad = jnp.pad(x_flat, ((0, 0), (0, Cp - Cin), (0, 0)))

    # Tap-major weights flattened for the im2col matmul:
    #   w_flat[o, t*Cp + i] = w[t, o, i]   (padded rows/cols are zero)
    def prep(w, b, cin_p, cout_p):
        kk, co, ci = w.shape
        wp = jnp.zeros((kk, cout_p, cin_p), jnp.float32).at[:, :co, :ci].set(w)
        w_flat = wp.transpose(1, 0, 2).reshape(cout_p, kk * cin_p).astype(mxu_dtype)
        bp = jnp.zeros((cout_p, 1), jnp.float32).at[:co].set(b)
        return w_flat, bp

    w1f, b1p = prep(w1, b1, Cp, Cp)
    w2f, b2p = prep(w2, b2, Cp, Cout_p)

    shifts, masks = _make_taps_and_masks(H, W, K)

    # Images per grid step: amortize per-step overhead but keep >= 2 steps when
    # possible (pipelining / megacore on v7x).
    nb = 1
    for cand in (4, 2):
        if N % cand == 0 and N // cand >= 2:
            nb = cand
            break

    kern = functools.partial(fused_postconv_kernel, shifts=shifts, hw=HW, nb=nb)
    y, stats = pl.pallas_call(
        kern,
        out_shape=(
            jax.ShapeDtypeStruct((N, Cout_p, HW), jnp.float32),
            jax.ShapeDtypeStruct((N, Cout_p, 2), jnp.float32),
        ),
        grid=(N // nb,),
        in_specs=[
            pl.BlockSpec((nb, Cp, HW), lambda n: (n, 0, 0)),
            pl.BlockSpec((KK, 1, HW), lambda n: (0, 0, 0)),     # masks: resident
            pl.BlockSpec((Cp, KK * Cp), lambda n: (0, 0)),      # w1: resident
            pl.BlockSpec((Cp, 1), lambda n: (0, 0)),
            pl.BlockSpec((Cout_p, KK * Cp), lambda n: (0, 0)),  # w2: resident
            pl.BlockSpec((Cout_p, 1), lambda n: (0, 0)),
        ],
        out_specs=(
            pl.BlockSpec((nb, Cout_p, HW), lambda n: (n, 0, 0)),
            pl.BlockSpec((nb, Cout_p, 2), lambda n: (n, 0, 0)),
        ),
        scratch_shapes=[pltpu.VMEM((KK * Cp, HW), mxu_dtype)],
        compiler_params=pltpu.CompilerParams(
            dimension_semantics=("parallel",)),
    )(x_pad, masks, w1f, b1p, w2f, b2p)

    # BatchNorm2d (training mode): batch statistics, biased variance.
    # Chan's parallel-variance combine of per-image (sum, centered M2).
    cnt = jnp.float32(HW)
    tot = jnp.float32(N * HW)
    s_n = stats[:, :Cout, 0]                                    # (N, Cout)
    m2_n = stats[:, :Cout, 1]                                   # (N, Cout)
    mean = jnp.sum(s_n, axis=0) / tot                           # (Cout,)
    var = (jnp.sum(m2_n, axis=0)
           + cnt * jnp.sum((s_n / cnt - mean) ** 2, axis=0)) / tot
    eps = jnp.float32(1e-5)
    scale = params["gamma"] * jax.lax.rsqrt(var + eps)
    shift = params["beta"] - mean * scale

    # BN affine + ReLU: trivial per-channel elementwise pass — left to XLA,
    # which fuses it into a single HBM sweep (no second Pallas launch).
    y_real = y[:, :Cout, :]
    out = jnp.maximum(y_real * scale[None, :, None] + shift[None, :, None], 0.0)
    return out.reshape(N, Cout, H, W)


post_conv_forward_jit = jax.jit(post_conv_forward, static_argnames=("mxu_dtype",))


# ----------------------------------------------------------------------------
# Parameter construction (deterministic, synthetic)
# ----------------------------------------------------------------------------
def make_params(key, kernel_size, in_channels, out_channels):
    b1channel = in_channels + (out_channels - in_channels) // 2
    KK = kernel_size * kernel_size
    k1, k2, k3, k4 = jax.random.split(key, 4)
    # Conv weights stored tap-major: (K*K, Cout, Cin), tap t = kh*K + kw.
    w1 = 0.1 * jax.random.normal(k1, (KK, b1channel, in_channels), jnp.float32)
    b1 = 0.05 * jax.random.normal(k2, (b1channel, 1), jnp.float32)
    w2 = 0.1 * jax.random.normal(k3, (KK, out_channels, b1channel), jnp.float32)
    b2 = 0.05 * jax.random.normal(k4, (out_channels, 1), jnp.float32)
    gamma = jnp.ones((out_channels,), jnp.float32)   # BatchNorm2d default init
    beta = jnp.zeros((out_channels,), jnp.float32)
    return {"w1": w1, "b1": b1, "w2": w2, "b2": b2, "gamma": gamma, "beta": beta}


# ----------------------------------------------------------------------------
# Reference (plain JAX) for a correctness sanity check
# ----------------------------------------------------------------------------
def post_conv_reference(x_nchw, params):
    def conv(x, w, b):                       # x NCHW, w (K*K, Cout, Cin)
        KK, Co, Ci = w.shape
        k = int(round(KK ** 0.5))
        w_oihw = w.reshape(k, k, Co, Ci).transpose(2, 3, 0, 1)
        y = jax.lax.conv_general_dilated(
            x, w_oihw, window_strides=(1, 1), padding="SAME",
            dimension_numbers=("NCHW", "OIHW", "NCHW"))
        return y + b.reshape(1, -1, 1, 1)

    h = jax.nn.relu(conv(x_nchw, params["w1"], params["b1"]))
    y = conv(h, params["w2"], params["b2"])
    mean = jnp.mean(y, axis=(0, 2, 3), keepdims=True)
    var = jnp.mean((y - mean) ** 2, axis=(0, 2, 3), keepdims=True)
    yhat = (y - mean) * jax.lax.rsqrt(var + 1e-5)
    yhat = yhat * params["gamma"].reshape(1, -1, 1, 1) + params["beta"].reshape(1, -1, 1, 1)
    return jax.nn.relu(yhat)


if __name__ == "__main__":
    key = jax.random.PRNGKey(0)
    kx, kp = jax.random.split(key)

    N, Cin, H, W = 2, 4, 16, 16
    Cout = 8
    kernel_size = 3

    x = jax.random.normal(kx, (N, Cin, H, W), jnp.float32)
    params = make_params(kp, kernel_size, Cin, Cout)

    out = jax.block_until_ready(post_conv_forward_jit(x, params))

    ref = post_conv_reference(x, params)
    assert out.shape == (N, Cout, H, W)
    max_err = float(jnp.max(jnp.abs(out - ref)))
    assert jnp.allclose(out, ref, atol=1e-4, rtol=1e-4), max_err

    print("KERNEL_OK")
</pallas_src>

<mosaic_0001>
module attributes {stable_mosaic.version = 11 : i64} {
  func.func @fused_postconv_kernel(%arg0: i32, %arg1: memref<1x8x256xf32, #tpu.memory_space<vmem>>, %arg2: memref<9x1x256xf32, #tpu.memory_space<vmem>>, %arg3: memref<8x72xf32, #tpu.memory_space<vmem>>, %arg4: memref<8x1xf32, #tpu.memory_space<vmem>>, %arg5: memref<8x72xf32, #tpu.memory_space<vmem>>, %arg6: memref<8x1xf32, #tpu.memory_space<vmem>>, %arg7: memref<1x8x256xf32, #tpu.memory_space<vmem>>, %arg8: memref<1x8x2xf32, #tpu.memory_space<vmem>>, %arg9: memref<72x256xf32, #tpu.memory_space<vmem>>) attributes {dimension_semantics = [#tpu.dimension_semantics<parallel>], iteration_bounds = array<i64: 2>, scalar_prefetch = 0 : i64, scratch_operands = 1 : i64, tpu.core_type = #tpu.core_type<tc>, window_params = [{transform_indices = @transform_0, window_bounds = array<i64: 1, 8, 256>}, {pipeline_mode = #tpu.pipeline_mode<synchronous>, transform_indices = @transform_1, window_bounds = array<i64: 9, 1, 256>}, {pipeline_mode = #tpu.pipeline_mode<synchronous>, transform_indices = @transform_2, window_bounds = array<i64: 8, 72>}, {pipeline_mode = #tpu.pipeline_mode<synchronous>, transform_indices = @transform_3, window_bounds = array<i64: 8, 1>}, {pipeline_mode = #tpu.pipeline_mode<synchronous>, transform_indices = @transform_4, window_bounds = array<i64: 8, 72>}, {pipeline_mode = #tpu.pipeline_mode<synchronous>, transform_indices = @transform_5, window_bounds = array<i64: 8, 1>}, {transform_indices = @transform_6, window_bounds = array<i64: 1, 8, 256>}, {transform_indices = @transform_7, window_bounds = array<i64: 1, 8, 2>}]} {
    %c0 = arith.constant 0 : index
    %c0_0 = arith.constant 0 : index
    %0 = vector.load %arg3[%c0, %c0_0] : memref<8x72xf32, #tpu.memory_space<vmem>>, vector<8x72xf32>
    %c0_1 = arith.constant 0 : index
    %c0_2 = arith.constant 0 : index
    %1 = vector.load %arg5[%c0_1, %c0_2] : memref<8x72xf32, #tpu.memory_space<vmem>>, vector<8x72xf32>
    %c0_3 = arith.constant 0 : index
    %c0_4 = arith.constant 0 : index
    %2 = vector.load %arg4[%c0_3, %c0_4] : memref<8x1xf32, #tpu.memory_space<vmem>>, vector<8x1xf32>
    %c0_5 = arith.constant 0 : index
    %c0_6 = arith.constant 0 : index
    %3 = vector.load %arg6[%c0_5, %c0_6] : memref<8x1xf32, #tpu.memory_space<vmem>>, vector<8x1xf32>
    %c0_7 = arith.constant 0 : index
    %c0_8 = arith.constant 0 : index
    %c0_9 = arith.constant 0 : index
    %4 = vector.load %arg1[%c0_7, %c0_8, %c0_9] : memref<1x8x256xf32, #tpu.memory_space<vmem>>, vector<1x8x256xf32>
    %5 = vector.shape_cast %4 : vector<1x8x256xf32> to vector<8x256xf32>
    %c17_i32 = arith.constant 17 : i32
    %6 = tpu.dynamic_rotate %5 by %c17_i32 dim 1 : vector<8x256xf32>, i32 -> vector<8x256xf32>
    %c0_10 = arith.constant 0 : index
    %c0_11 = arith.constant 0 : index
    %c0_12 = arith.constant 0 : index
    %7 = vector.load %arg2[%c0_10, %c0_11, %c0_12] : memref<9x1x256xf32, #tpu.memory_space<vmem>>, vector<1x1x256xf32>
    %8 = vector.shape_cast %7 : vector<1x1x256xf32> to vector<1x256xf32>
    %9 = vector.broadcast %8 : vector<1x256xf32> to vector<8x256xf32>
    %10 = arith.mulf %6, %9 : vector<8x256xf32>
    %c0_13 = arith.constant 0 : index
    %c0_14 = arith.constant 0 : index
    %11 = vector.load %arg9[%c0_13, %c0_14] : memref<72x256xf32, #tpu.memory_space<vmem>>, vector<8x256xf32>
    tpu.vector_store %arg9[%c0_13, %c0_14], %10 {strides = array<i32>} : memref<72x256xf32, #tpu.memory_space<vmem>>, vector<8x256xf32>,
    %c16_i32 = arith.constant 16 : i32
    %12 = tpu.dynamic_rotate %5 by %c16_i32 dim 1 : vector<8x256xf32>, i32 -> vector<8x256xf32>
    %c1 = arith.constant 1 : index
    %c0_15 = arith.constant 0 : index
    %c0_16 = arith.constant 0 : index
    %13 = vector.load %arg2[%c1, %c0_15, %c0_16] : memref<9x1x256xf32, #tpu.memory_space<vmem>>, vector<1x1x256xf32>
    %14 = vector.shape_cast %13 : vector<1x1x256xf32> to vector<1x256xf32>
    %15 = vector.broadcast %14 : vector<1x256xf32> to vector<8x256xf32>
    %16 = arith.mulf %12, %15 : vector<8x256xf32>
    %c8 = arith.constant 8 : index
    %c0_17 = arith.constant 0 : index
    %17 = vector.load %arg9[%c8, %c0_17] : memref<72x256xf32, #tpu.memory_space<vmem>>, vector<8x256xf32>
    tpu.vector_store %arg9[%c8, %c0_17], %16 {strides = array<i32>} : memref<72x256xf32, #tpu.memory_space<vmem>>, vector<8x256xf32>,
    %c15_i32 = arith.constant 15 : i32
    %18 = tpu.dynamic_rotate %5 by %c15_i32 dim 1 : vector<8x256xf32>, i32 -> vector<8x256xf32>
    %c2 = arith.constant 2 : index
    %c0_18 = arith.constant 0 : index
    %c0_19 = arith.constant 0 : index
    %19 = vector.load %arg2[%c2, %c0_18, %c0_19] : memref<9x1x256xf32, #tpu.memory_space<vmem>>, vector<1x1x256xf32>
    %20 = vector.shape_cast %19 : vector<1x1x256xf32> to vector<1x256xf32>
    %21 = vector.broadcast %20 : vector<1x256xf32> to vector<8x256xf32>
    %22 = arith.mulf %18, %21 : vector<8x256xf32>
    %c16 = arith.constant 16 : index
    %c0_20 = arith.constant 0 : index
    %23 = vector.load %arg9[%c16, %c0_20] : memref<72x256xf32, #tpu.memory_space<vmem>>, vector<8x256xf32>
    tpu.vector_store %arg9[%c16, %c0_20], %22 {strides = array<i32>} : memref<72x256xf32, #tpu.memory_space<vmem>>, vector<8x256xf32>,
    %c1_i32 = arith.constant 1 : i32
    %24 = tpu.dynamic_rotate %5 by %c1_i32 dim 1 : vector<8x256xf32>, i32 -> vector<8x256xf32>
    %c3 = arith.constant 3 : index
    %c0_21 = arith.constant 0 : index
    %c0_22 = arith.constant 0 : index
    %25 = vector.load %arg2[%c3, %c0_21, %c0_22] : memref<9x1x256xf32, #tpu.memory_space<vmem>>, vector<1x1x256xf32>
    %26 = vector.shape_cast %25 : vector<1x1x256xf32> to vector<1x256xf32>
    %27 = vector.broadcast %26 : vector<1x256xf32> to vector<8x256xf32>
    %28 = arith.mulf %24, %27 : vector<8x256xf32>
    %c24 = arith.constant 24 : index
    %c0_23 = arith.constant 0 : index
    %29 = vector.load %arg9[%c24, %c0_23] : memref<72x256xf32, #tpu.memory_space<vmem>>, vector<8x256xf32>
    tpu.vector_store %arg9[%c24, %c0_23], %28 {strides = array<i32>} : memref<72x256xf32, #tpu.memory_space<vmem>>, vector<8x256xf32>,
    %c32 = arith.constant 32 : index
    %c0_24 = arith.constant 0 : index
    %30 = vector.load %arg9[%c32, %c0_24] : memref<72x256xf32, #tpu.memory_space<vmem>>, vector<8x256xf32>
    tpu.vector_store %arg9[%c32, %c0_24], %5 {strides = array<i32>} : memref<72x256xf32, #tpu.memory_space<vmem>>, vector<8x256xf32>,
    %c255_i32 = arith.constant 255 : i32
    %31 = tpu.dynamic_rotate %5 by %c255_i32 dim 1 : vector<8x256xf32>, i32 -> vector<8x256xf32>
    %c5 = arith.constant 5 : index
    %c0_25 = arith.constant 0 : index
    %c0_26 = arith.constant 0 : index
    %32 = vector.load %arg2[%c5, %c0_25, %c0_26] : memref<9x1x256xf32, #tpu.memory_space<vmem>>, vector<1x1x256xf32>
    %33 = vector.shape_cast %32 : vector<1x1x256xf32> to vector<1x256xf32>
    %34 = vector.broadcast %33 : vector<1x256xf32> to vector<8x256xf32>
    %35 = arith.mulf %31, %34 : vector<8x256xf32>
    %c40 = arith.constant 40 : index
    %c0_27 = arith.constant 0 : index
    %36 = vector.load %arg9[%c40, %c0_27] : memref<72x256xf32, #tpu.memory_space<vmem>>, vector<8x256xf32>
    tpu.vector_store %arg9[%c40, %c0_27], %35 {strides = array<i32>} : memref<72x256xf32, #tpu.memory_space<vmem>>, vector<8x256xf32>,
    %c241_i32 = arith.constant 241 : i32
    %37 = tpu.dynamic_rotate %5 by %c241_i32 dim 1 : vector<8x256xf32>, i32 -> vector<8x256xf32>
    %c6 = arith.constant 6 : index
    %c0_28 = arith.constant 0 : index
    %c0_29 = arith.constant 0 : index
    %38 = vector.load %arg2[%c6, %c0_28, %c0_29] : memref<9x1x256xf32, #tpu.memory_space<vmem>>, vector<1x1x256xf32>
    %39 = vector.shape_cast %38 : vector<1x1x256xf32> to vector<1x256xf32>
    %40 = vector.broadcast %39 : vector<1x256xf32> to vector<8x256xf32>
    %41 = arith.mulf %37, %40 : vector<8x256xf32>
    %c48 = arith.constant 48 : index
    %c0_30 = arith.constant 0 : index
    %42 = vector.load %arg9[%c48, %c0_30] : memref<72x256xf32, #tpu.memory_space<vmem>>, vector<8x256xf32>
    tpu.vector_store %arg9[%c48, %c0_30], %41 {strides = array<i32>} : memref<72x256xf32, #tpu.memory_space<vmem>>, vector<8x256xf32>,
    %c240_i32 = arith.constant 240 : i32
    %43 = tpu.dynamic_rotate %5 by %c240_i32 dim 1 : vector<8x256xf32>, i32 -> vector<8x256xf32>
    %c7 = arith.constant 7 : index
    %c0_31 = arith.constant 0 : index
    %c0_32 = arith.constant 0 : index
    %44 = vector.load %arg2[%c7, %c0_31, %c0_32] : memref<9x1x256xf32, #tpu.memory_space<vmem>>, vector<1x1x256xf32>
    %45 = vector.shape_cast %44 : vector<1x1x256xf32> to vector<1x256xf32>
    %46 = vector.broadcast %45 : vector<1x256xf32> to vector<8x256xf32>
    %47 = arith.mulf %43, %46 : vector<8x256xf32>
    %c56 = arith.constant 56 : index
    %c0_33 = arith.constant 0 : index
    %48 = vector.load %arg9[%c56, %c0_33] : memref<72x256xf32, #tpu.memory_space<vmem>>, vector<8x256xf32>
    tpu.vector_store %arg9[%c56, %c0_33], %47 {strides = array<i32>} : memref<72x256xf32, #tpu.memory_space<vmem>>, vector<8x256xf32>,
    %c239_i32 = arith.constant 239 : i32
    %49 = tpu.dynamic_rotate %5 by %c239_i32 dim 1 : vector<8x256xf32>, i32 -> vector<8x256xf32>
    %c8_34 = arith.constant 8 : index
    %c0_35 = arith.constant 0 : index
    %c0_36 = arith.constant 0 : index
    %50 = vector.load %arg2[%c8_34, %c0_35, %c0_36] : memref<9x1x256xf32, #tpu.memory_space<vmem>>, vector<1x1x256xf32>
    %51 = vector.shape_cast %50 : vector<1x1x256xf32> to vector<1x256xf32>
    %52 = vector.broadcast %51 : vector<1x256xf32> to vector<8x256xf32>
    %53 = arith.mulf %49, %52 : vector<8x256xf32>
    %c64 = arith.constant 64 : index
    %c0_37 = arith.constant 0 : index
    %54 = vector.load %arg9[%c64, %c0_37] : memref<72x256xf32, #tpu.memory_space<vmem>>, vector<8x256xf32>
    tpu.vector_store %arg9[%c64, %c0_37], %53 {strides = array<i32>} : memref<72x256xf32, #tpu.memory_space<vmem>>, vector<8x256xf32>,
    %c0_38 = arith.constant 0 : index
    %c0_39 = arith.constant 0 : index
    %55 = vector.load %arg9[%c0_38, %c0_39] : memref<72x256xf32, #tpu.memory_space<vmem>>, vector<72x256xf32>
    %cst = arith.constant dense<0.000000e+00> : vector<8x256xf32>
    %56 = tpu.matmul %0, %55, %cst {dimension_numbers = #tpu.dot_dimension_numbers<[1], [0], [0], [1], [0, 0, 1, 1], [], []>} : vector<8x72xf32>, vector<72x256xf32>, vector<8x256xf32> -> vector<8x256xf32>
    %57 = vector.broadcast %2 : vector<8x1xf32> to vector<8x256xf32>
    %58 = arith.addf %56, %57 : vector<8x256xf32>
    %cst_40 = arith.constant 0.000000e+00 : f32
    %59 = vector.broadcast %cst_40 : f32 to vector<8x256xf32>
    %60 = arith.maximumf %58, %59 : vector<8x256xf32>
    %c17_i32_41 = arith.constant 17 : i32
    %61 = tpu.dynamic_rotate %60 by %c17_i32_41 dim 1 : vector<8x256xf32>, i32 -> vector<8x256xf32>
    %c0_42 = arith.constant 0 : index
    %c0_43 = arith.constant 0 : index
    %c0_44 = arith.constant 0 : index
    %62 = vector.load %arg2[%c0_42, %c0_43, %c0_44] : memref<9x1x256xf32, #tpu.memory_space<vmem>>, vector<1x1x256xf32>
    %63 = vector.shape_cast %62 : vector<1x1x256xf32> to vector<1x256xf32>
    %64 = vector.broadcast %63 : vector<1x256xf32> to vector<8x256xf32>
    %65 = arith.mulf %61, %64 : vector<8x256xf32>
    %c0_45 = arith.constant 0 : index
    %c0_46 = arith.constant 0 : index
    %66 = vector.load %arg9[%c0_45, %c0_46] : memref<72x256xf32, #tpu.memory_space<vmem>>, vector<8x256xf32>
    tpu.vector_store %arg9[%c0_45, %c0_46], %65 {strides = array<i32>} : memref<72x256xf32, #tpu.memory_space<vmem>>, vector<8x256xf32>,
    %c16_i32_47 = arith.constant 16 : i32
    %67 = tpu.dynamic_rotate %60 by %c16_i32_47 dim 1 : vector<8x256xf32>, i32 -> vector<8x256xf32>
    %c1_48 = arith.constant 1 : index
    %c0_49 = arith.constant 0 : index
    %c0_50 = arith.constant 0 : index
    %68 = vector.load %arg2[%c1_48, %c0_49, %c0_50] : memref<9x1x256xf32, #tpu.memory_space<vmem>>, vector<1x1x256xf32>
    %69 = vector.shape_cast %68 : vector<1x1x256xf32> to vector<1x256xf32>
    %70 = vector.broadcast %69 : vector<1x256xf32> to vector<8x256xf32>
    %71 = arith.mulf %67, %70 : vector<8x256xf32>
    %c8_51 = arith.constant 8 : index
    %c0_52 = arith.constant 0 : index
    %72 = vector.load %arg9[%c8_51, %c0_52] : memref<72x256xf32, #tpu.memory_space<vmem>>, vector<8x256xf32>
    tpu.vector_store %arg9[%c8_51, %c0_52], %71 {strides = array<i32>} : memref<72x256xf32, #tpu.memory_space<vmem>>, vector<8x256xf32>,
    %c15_i32_53 = arith.constant 15 : i32
    %73 = tpu.dynamic_rotate %60 by %c15_i32_53 dim 1 : vector<8x256xf32>, i32 -> vector<8x256xf32>
    %c2_54 = arith.constant 2 : index
    %c0_55 = arith.constant 0 : index
    %c0_56 = arith.constant 0 : index
    %74 = vector.load %arg2[%c2_54, %c0_55, %c0_56] : memref<9x1x256xf32, #tpu.memory_space<vmem>>, vector<1x1x256xf32>
    %75 = vector.shape_cast %74 : vector<1x1x256xf32> to vector<1x256xf32>
    %76 = vector.broadcast %75 : vector<1x256xf32> to vector<8x256xf32>
    %77 = arith.mulf %73, %76 : vector<8x256xf32>
    %c16_57 = arith.constant 16 : index
    %c0_58 = arith.constant 0 : index
    %78 = vector.load %arg9[%c16_57, %c0_58] : memref<72x256xf32, #tpu.memory_space<vmem>>, vector<8x256xf32>
    tpu.vector_store %arg9[%c16_57, %c0_58], %77 {strides = array<i32>} : memref<72x256xf32, #tpu.memory_space<vmem>>, vector<8x256xf32>,
    %c1_i32_59 = arith.constant 1 : i32
    %79 = tpu.dynamic_rotate %60 by %c1_i32_59 dim 1 : vector<8x256xf32>, i32 -> vector<8x256xf32>
    %c3_60 = arith.constant 3 : index
    %c0_61 = arith.constant 0 : index
    %c0_62 = arith.constant 0 : index
    %80 = vector.load %arg2[%c3_60, %c0_61, %c0_62] : memref<9x1x256xf32, #tpu.memory_space<vmem>>, vector<1x1x256xf32>
    %81 = vector.shape_cast %80 : vector<1x1x256xf32> to vector<1x256xf32>
    %82 = vector.broadcast %81 : vector<1x256xf32> to vector<8x256xf32>
    %83 = arith.mulf %79, %82 : vector<8x256xf32>
    %c24_63 = arith.constant 24 : index
    %c0_64 = arith.constant 0 : index
    %84 = vector.load %arg9[%c24_63, %c0_64] : memref<72x256xf32, #tpu.memory_space<vmem>>, vector<8x256xf32>
    tpu.vector_store %arg9[%c24_63, %c0_64], %83 {strides = array<i32>} : memref<72x256xf32, #tpu.memory_space<vmem>>, vector<8x256xf32>,
    %c32_65 = arith.constant 32 : index
    %c0_66 = arith.constant 0 : index
    %85 = vector.load %arg9[%c32_65, %c0_66] : memref<72x256xf32, #tpu.memory_space<vmem>>, vector<8x256xf32>
    tpu.vector_store %arg9[%c32_65, %c0_66], %60 {strides = array<i32>} : memref<72x256xf32, #tpu.memory_space<vmem>>, vector<8x256xf32>,
    %c255_i32_67 = arith.constant 255 : i32
    %86 = tpu.dynamic_rotate %60 by %c255_i32_67 dim 1 : vector<8x256xf32>, i32 -> vector<8x256xf32>
    %c5_68 = arith.constant 5 : index
    %c0_69 = arith.constant 0 : index
    %c0_70 = arith.constant 0 : index
    %87 = vector.load %arg2[%c5_68, %c0_69, %c0_70] : memref<9x1x256xf32, #tpu.memory_space<vmem>>, vector<1x1x256xf32>
    %88 = vector.shape_cast %87 : vector<1x1x256xf32> to vector<1x256xf32>
    %89 = vector.broadcast %88 : vector<1x256xf32> to vector<8x256xf32>
    %90 = arith.mulf %86, %89 : vector<8x256xf32>
    %c40_71 = arith.constant 40 : index
    %c0_72 = arith.constant 0 : index
    %91 = vector.load %arg9[%c40_71, %c0_72] : memref<72x256xf32, #tpu.memory_space<vmem>>, vector<8x256xf32>
    tpu.vector_store %arg9[%c40_71, %c0_72], %90 {strides = array<i32>} : memref<72x256xf32, #tpu.memory_space<vmem>>, vector<8x256xf32>,
    %c241_i32_73 = arith.constant 241 : i32
    %92 = tpu.dynamic_rotate %60 by %c241_i32_73 dim 1 : vector<8x256xf32>, i32 -> vector<8x256xf32>
    %c6_74 = arith.constant 6 : index
    %c0_75 = arith.constant 0 : index
    %c0_76 = arith.constant 0 : index
    %93 = vector.load %arg2[%c6_74, %c0_75, %c0_76] : memref<9x1x256xf32, #tpu.memory_space<vmem>>, vector<1x1x256xf32>
    %94 = vector.shape_cast %93 : vector<1x1x256xf32> to vector<1x256xf32>
    %95 = vector.broadcast %94 : vector<1x256xf32> to vector<8x256xf32>
    %96 = arith.mulf %92, %95 : vector<8x256xf32>
    %c48_77 = arith.constant 48 : index
    %c0_78 = arith.constant 0 : index
    %97 = vector.load %arg9[%c48_77, %c0_78] : memref<72x256xf32, #tpu.memory_space<vmem>>, vector<8x256xf32>
    tpu.vector_store %arg9[%c48_77, %c0_78], %96 {strides = array<i32>} : memref<72x256xf32, #tpu.memory_space<vmem>>, vector<8x256xf32>,
    %c240_i32_79 = arith.constant 240 : i32
    %98 = tpu.dynamic_rotate %60 by %c240_i32_79 dim 1 : vector<8x256xf32>, i32 -> vector<8x256xf32>
    %c7_80 = arith.constant 7 : index
    %c0_81 = arith.constant 0 : index
    %c0_82 = arith.constant 0 : index
    %99 = vector.load %arg2[%c7_80, %c0_81, %c0_82] : memref<9x1x256xf32, #tpu.memory_space<vmem>>, vector<1x1x256xf32>
    %100 = vector.shape_cast %99 : vector<1x1x256xf32> to vector<1x256xf32>
    %101 = vector.broadcast %100 : vector<1x256xf32> to vector<8x256xf32>
    %102 = arith.mulf %98, %101 : vector<8x256xf32>
    %c56_83 = arith.constant 56 : index
    %c0_84 = arith.constant 0 : index
    %103 = vector.load %arg9[%c56_83, %c0_84] : memref<72x256xf32, #tpu.memory_space<vmem>>, vector<8x256xf32>
    tpu.vector_store %arg9[%c56_83, %c0_84], %102 {strides = array<i32>} : memref<72x256xf32, #tpu.memory_space<vmem>>, vector<8x256xf32>,
    %c239_i32_85 = arith.constant 239 : i32
    %104 = tpu.dynamic_rotate %60 by %c239_i32_85 dim 1 : vector<8x256xf32>, i32 -> vector<8x256xf32>
    %c8_86 = arith.constant 8 : index
    %c0_87 = arith.constant 0 : index
    %c0_88 = arith.constant 0 : index
    %105 = vector.load %arg2[%c8_86, %c0_87, %c0_88] : memref<9x1x256xf32, #tpu.memory_space<vmem>>, vector<1x1x256xf32>
    %106 = vector.shape_cast %105 : vector<1x1x256xf32> to vector<1x256xf32>
    %107 = vector.broadcast %106 : vector<1x256xf32> to vector<8x256xf32>
    %108 = arith.mulf %104, %107 : vector<8x256xf32>
    %c64_89 = arith.constant 64 : index
    %c0_90 = arith.constant 0 : index
    %109 = vector.load %arg9[%c64_89, %c0_90] : memref<72x256xf32, #tpu.memory_space<vmem>>, vector<8x256xf32>
    tpu.vector_store %arg9[%c64_89, %c0_90], %108 {strides = array<i32>} : memref<72x256xf32, #tpu.memory_space<vmem>>, vector<8x256xf32>,
    %c0_91 = arith.constant 0 : index
    %c0_92 = arith.constant 0 : index
    %110 = vector.load %arg9[%c0_91, %c0_92] : memref<72x256xf32, #tpu.memory_space<vmem>>, vector<72x256xf32>
    %cst_93 = arith.constant dense<0.000000e+00> : vector<8x256xf32>
    %111 = tpu.matmul %1, %110, %cst_93 {dimension_numbers = #tpu.dot_dimension_numbers<[1], [0], [0], [1], [0, 0, 1, 1], [], []>} : vector<8x72xf32>, vector<72x256xf32>, vector<8x256xf32> -> vector<8x256xf32>
    %112 = vector.broadcast %3 : vector<8x1xf32> to vector<8x256xf32>
    %113 = arith.addf %111, %112 : vector<8x256xf32>
    %c0_94 = arith.constant 0 : index
    %c0_95 = arith.constant 0 : index
    %c0_96 = arith.constant 0 : index
    %114 = vector.load %arg7[%c0_94, %c0_95, %c0_96] : memref<1x8x256xf32, #tpu.memory_space<vmem>>, vector<1x8x256xf32>
    %115 = vector.shape_cast %114 : vector<1x8x256xf32> to vector<8x256xf32>
    %116 = vector.shape_cast %113 : vector<8x256xf32> to vector<1x8x256xf32>
    tpu.vector_store %arg7[%c0_94, %c0_95, %c0_96], %116 {strides = array<i32>} : memref<1x8x256xf32, #tpu.memory_space<vmem>>, vector<1x8x256xf32>,
    %cst_97 = arith.constant dense<0.000000e+00> : vector<8xf32>
    %117 = vector.multi_reduction <add>, %113, %cst_97 [1] : vector<8x256xf32> to vector<8xf32>
    %118 = vector.shape_cast %117 : vector<8xf32> to vector<8x1xf32>
    %cst_98 = arith.constant 3.906250e-03 : f32
    %119 = vector.broadcast %cst_98 : f32 to vector<8x1xf32>
    %120 = arith.mulf %118, %119 : vector<8x1xf32>
    %121 = vector.broadcast %120 : vector<8x1xf32> to vector<8x256xf32>
    %122 = arith.subf %113, %121 : vector<8x256xf32>
    %123 = arith.mulf %122, %122 : vector<8x256xf32>
    %cst_99 = arith.constant dense<0.000000e+00> : vector<8xf32>
    %124 = vector.multi_reduction <add>, %123, %cst_99 [1] : vector<8x256xf32> to vector<8xf32>
    %125 = vector.shape_cast %124 : vector<8xf32> to vector<8x1xf32>
    %126 = tpu.concatenate %118, %125 in 1 : vector<8x1xf32>, vector<8x1xf32> -> vector<8x2xf32>
    %c0_100 = arith.constant 0 : index
    %c0_101 = arith.constant 0 : index
    %c0_102 = arith.constant 0 : index
    %127 = vector.load %arg8[%c0_100, %c0_101, %c0_102] : memref<1x8x2xf32, #tpu.memory_space<vmem>>, vector<1x8x2xf32>
    %128 = vector.shape_cast %127 : vector<1x8x2xf32> to vector<8x2xf32>
    %129 = vector.shape_cast %126 : vector<8x2xf32> to vector<1x8x2xf32>
    tpu.vector_store %arg8[%c0_100, %c0_101, %c0_102], %129 {strides = array<i32>} : memref<1x8x2xf32, #tpu.memory_space<vmem>>, vector<1x8x2xf32>,
    return
  }
  func.func @transform_0(%arg0: i32) -> (i32, i32, i32) {
    %c0_i32 = arith.constant 0 : i32
    %c0_i32_0 = arith.constant 0 : i32
    %c0_i32_1 = arith.constant 0 : i32
    return %arg0, %c0_i32, %c0_i32_0 : i32, i32, i32
  }
  func.func @transform_1(%arg0: i32) -> (i32, i32, i32) {
    %c0_i32 = arith.constant 0 : i32
    %c0_i32_0 = arith.constant 0 : i32
    %c0_i32_1 = arith.constant 0 : i32
    %c0_i32_2 = arith.constant 0 : i32
    return %c0_i32, %c0_i32_0, %c0_i32_1 : i32, i32, i32
  }
  func.func @transform_2(%arg0: i32) -> (i32, i32) {
    %c0_i32 = arith.constant 0 : i32
    %c0_i32_0 = arith.constant 0 : i32
    %c0_i32_1 = arith.constant 0 : i32
    return %c0_i32, %c0_i32_0 : i32, i32
  }
  func.func @transform_3(%arg0: i32) -> (i32, i32) {
    %c0_i32 = arith.constant 0 : i32
    %c0_i32_0 = arith.constant 0 : i32
    %c0_i32_1 = arith.constant 0 : i32
    return %c0_i32, %c0_i32_0 : i32, i32
  }
  func.func @transform_4(%arg0: i32) -> (i32, i32) {
    %c0_i32 = arith.constant 0 : i32
    %c0_i32_0 = arith.constant 0 : i32
    %c0_i32_1 = arith.constant 0 : i32
    return %c0_i32, %c0_i32_0 : i32, i32
  }
  func.func @transform_5(%arg0: i32) -> (i32, i32) {
    %c0_i32 = arith.constant 0 : i32
    %c0_i32_0 = arith.constant 0 : i32
    %c0_i32_1 = arith.constant 0 : i32
    return %c0_i32, %c0_i32_0 : i32, i32
  }
  func.func @transform_6(%arg0: i32) -> (i32, i32, i32) {
    %c0_i32 = arith.constant 0 : i32
    %c0_i32_0 = arith.constant 0 : i32
    %c0_i32_1 = arith.constant 0 : i32
    return %arg0, %c0_i32, %c0_i32_0 : i32, i32, i32
  }
  func.func @transform_7(%arg0: i32) -> (i32, i32, i32) {
    %c0_i32 = arith.constant 0 : i32
    %c0_i32_0 = arith.constant 0 : i32
    %c0_i32_1 = arith.constant 0 : i32
    return %arg0, %c0_i32, %c0_i32_0 : i32, i32, i32
  }
}

</mosaic_0001>

<bundles_post_ra>
// kernel: post_conv_forward.1
= control target key start
LH: loop header
LB: loop body
LE: loop exit
PB: predicated region body
PF: predicated region fallthrough
CT: control target
= control target key end

     0   :  { %s919_s24 = smov 0   ;;  %s1161_s0 = inlined_call_operand.vmem [shape: f32[2,8,256], index: 0, kind: input, shape index: {}]   ;;  %s1162_s1 = inlined_call_operand.vmem [shape: f32[9,1,256], index: 1, kind: input, shape index: {}]   ;;  %s1163_s2 = inlined_call_operand.vmem [shape: f32[8,72], index: 2, kind: input, shape index: {}]   ;;  %s1164_s3 = inlined_call_operand.vmem [shape: f32[8,1], index: 3, kind: input, shape index: {}]   ;;  %s1165_s4 = inlined_call_operand.vmem [shape: f32[8,72], index: 4, kind: input, shape index: {}]   ;;  %s1166_s5 = inlined_call_operand.vmem [shape: f32[8,1], index: 5, kind: input, shape index: {}]   ;;  %s1167_s6 = inlined_call_operand.vmem [shape: f32[2,8,256], index: 6, kind: output, shape index: {0}]   ;;  %s1168_s7 = inlined_call_operand.vmem [shape: f32[2,8,2], index: 7, kind: output, shape index: {1}]  }
   0x1 LB: > { %s811_s25 = sadd.s32 4294967295, %s868_s24   ;;  %p815_p0 = scmp.ge.s32.totalorder %s868_s24, 1  ;;  %s868_s24 = sphi %s919_s24, %s18_s24  }
   0x2   : > { %p240_p1 = scmp.lt.s32.totalorder %s868_s24, 3 }
   0x4   : > { %p241_p2 = pnand %p815_p0, %p240_p1 }
   0x5   : > { %p276_p3 = scmp.lt.s32.totalorder (!%p241_p2), %s811_s25, 1  ;;  %s870_s30 = smov (!%p241_p2), 112  }
   0x6   : > { %244 = sbr.rel (%p241_p2) target bundleno = 836 (0x344), region = 44  ;;  %s871_s8 = smov (!%p241_p2), 111  }
   0x7   : > { %s872_s9 = smov (!%p241_p2), 113   ;;  %s873_s10 = smov (!%p241_p2), 127  }
   0x8   : > { %s874_s11 = smov (!%p241_p2), 1   ;;  %s875_s12 = smov (!%p241_p2), 15  }
   0x9   : > { %s876_s13 = smov (!%p241_p2), 16   ;;  %s877_s14 = smov (!%p241_p2), 17  }
   0xb   : > { %s1170_s25 = smov (!%p276_p3, %s811_s25), 1  ;;  %v300_v3 = vlaneseq  ;;  %v827_v7 = vld [vmem:[%s1162_s1 + $0x10] sm:$0x3]  ;;  %v826_v9 = vld [vmem:[%s1162_s1 + $0xe] sm:$0x3]  ;;  %v292_v35 = vld [vmem:[%s1164_s3] sm:$0xff] }
   0xc   : > { %s841_s26 = sshll.u32 %s1170_s25, 4  ;;  %v435_v10 = vperm.slane %v827_v7, 0  ;;  %v436_v11 = vperm.slane %v827_v7, 1  ;;  %v825_v12 = vld [vmem:[%s1162_s1 + $0xc] sm:$0x3]  ;;  %v417_v15 = vperm.slane %v826_v9, 0 }
   0xd   : > { %s280_s29 = scalar_lea.vmem %s1161_s0, %s841_s26  ;;  %v971_v6 = vand.u32 127, %v300_v3  ;;  %v418_v16 = vperm.slane %v826_v9, 1  ;;  %v399_v23 = vperm.slane %v825_v12, 0  ;;  %v400_v24 = vperm.slane %v825_v12, 1  ;;  %v824_v27 = vld [vmem:[%s1162_s1 + $0xa] sm:$0x3] }
   0xe   : > { %v935_v0 = vld [vmem:[%s280_s29] sm:$0xff]  ;;  %v943_v1 = vld [vmem:[%s280_s29 + $0x8] sm:$0xff]  ;;  %v381_v33 = vperm.slane %v824_v27, 0  ;;  %v382_v34 = vperm.slane %v824_v27, 1  ;;  %v878_v36 = vmov 0   ;;  %vm466_vm8 = vcmask 588800  }
   0xf   : > { %407 = vrot.lane.b32.xlu1 %v935_v0, %s870_s30  ;;  %425 = vrot.lane.b32.xlu0 %v935_v0, %s871_s8  ;;  %vm411_vm0 = vcmp.lt.s32.totalorder %v971_v6, 112  ;;  %vm429_vm1 = vcmp.lt.s32.totalorder %v971_v6, 111  ;;  %vm393_vm2 = vcmp.lt.s32.totalorder %v971_v6, 113  ;;  %vm375_vm3 = vcmp.lt.s32.totalorder %v971_v6, 127  ;;  %v823_v43 = vld [vmem:[%s1162_s1 + $0x6] sm:$0x3] }
  0x10   : > { %389 = vrot.lane.b32.xlu2 %v935_v0, %s872_s9  ;;  %860 = vset.pattern.permute.xlu1 %v878_v36  ;;  %v822_v44 = vld [vmem:[%s1162_s1 + $0x4] sm:$0x3]  ;;  %vm355_vm4 = vcmp.lt.s32.totalorder %v971_v6, 1  ;;  %v361_v45 = vperm.slane %v823_v43, 0  ;;  %v362_v46 = vperm.slane %v823_v43, 1  ;;  %vm337_vm5 = vcmp.lt.s32.totalorder %v971_v6, 15 }
  0x11   : > { %861 = vset.pattern.permute.xlu0 %v878_v36  ;;  %v343_v48 = vperm.slane %v822_v44, 0  ;;  %v344_v49 = vperm.slane %v822_v44, 1  ;;  %v821_v60 = vld [vmem:[%s1162_s1 + $0x2] sm:$0x3]  ;;  %vm319_vm6 = vcmp.lt.s32.totalorder %v971_v6, 16  ;;  %vm302_vm7 = vcmp.lt.s32.totalorder %v971_v6, 17 }
  0x12   : > { %v325_v61 = vperm.slane %v821_v60, 0  ;;  %v326_v62 = vperm.slane %v821_v60, 1  ;;  %vm721_vm9 = vcmask 7168   ;;  %vm723_vm10 = vcmask 15360  }
  0x17   : > { %409 = vrot.lane.b32.xlu1 %v943_v1, %s870_s30  ;;  %427 = vrot.lane.b32.xlu0 %v943_v1, %s871_s8 }
  0x18   : > { %391 = vrot.lane.b32.xlu2 %v943_v1, %s872_s9 }
  0x1f   : > { %373 = vrot.lane.b32.xlu1 %v943_v1, %s873_s10  ;;  %371 = vrot.lane.b32.xlu0 %v935_v0, %s873_s10 }
  0x20   : > { %351 = vrot.lane.b32.xlu2 %v935_v0, %s874_s11 }
  0x27   : > { %333 = vrot.lane.b32.xlu1 %v935_v0, %s875_s12  ;;  %353 = vrot.lane.b32.xlu0 %v943_v1, %s874_s11 }
  0x28   : > { %335 = vrot.lane.b32.xlu2 %v943_v1, %s875_s12 }
  0x2f   : > { %317 = vrot.lane.b32.xlu1 %v943_v1, %s876_s13  ;;  %315 = vrot.lane.b32.xlu0 %v935_v0, %s876_s13 }
  0x30   : > { %296 = vrot.lane.b32.xlu2 %v935_v0, %s877_s14 }
  0x37   : > { %298 = vrot.lane.b32.xlu0 %v943_v1, %s877_s14  ;;  %463 = vperm.xlu1 %860, %v292_v35  }
  0x6a   : > { %v390_v2 = vpop.permute.xlu2 %389 }
  0x72   : > { %v392_v8 = vpop.permute.xlu2 %391 }
  0x73   : > { %v394_v25 = vsel %vm393_vm2, %v390_v2, %v392_v8  ;;  %v395_v26 = vsel %vm393_vm2, %v392_v8, %v390_v2 }
  0x74   : > { %v403_v31 = vmul.f32 %v399_v23, %v394_v25  ;;  %v404_v32 = vmul.f32 %v400_v24, %v395_v26  ;;  %v836_v25 = vld [vmem:[%s1162_s1 + $0x10] sm:$0x3]  ;;  %v835_v26 = vld [vmem:[%s1162_s1 + $0xe] sm:$0x3] }
  0x75   : > { %v634_v27 = vperm.slane %v836_v25, 0 }
  0x7a   : > { %v352_v30 = vpop.permute.xlu2 %351 }
  0x81   : > { %v408_v4 = vpop.permute.xlu1 %407  ;;  %v426_v5 = vpop.permute.xlu0 %425 }
  0x82   : > { %v336_v47 = vpop.permute.xlu2 %335 }
  0x89   : > { %v410_v13 = vpop.permute.xlu1 %409  ;;  %v428_v14 = vpop.permute.xlu0 %427 }
  0x8a   : > { %v412_v17 = vsel %vm411_vm0, %v408_v4, %v410_v13  ;;  %v413_v18 = vsel %vm411_vm0, %v410_v13, %v408_v4  ;;  %v430_v19 = vsel %vm429_vm1, %v426_v5, %v428_v14  ;;  %v431_v20 = vsel %vm429_vm1, %v428_v14, %v426_v5  ;;  %v305_v5 = vld [vmem:[%s1162_s1] sm:$0x3]  ;;  %v297_v7 = vpop.permute.xlu2 %296 }
  0x8b   : > { %v439_v21 = vmul.f32 %v435_v10, %v430_v19  ;;  %v440_v22 = vmul.f32 %v436_v11, %v431_v20  ;;  %v421_v28 = vmul.f32 %v417_v15, %v412_v17  ;;  %v422_v29 = vmul.f32 %v418_v16, %v413_v18  ;;  %v290_v15 = vld [vmem:[%s1163_s2] sm:$0xff] }
  0x8c   : > { %v307_v8 = vperm.slane %v305_v5, 0  ;;  %v308_v9 = vperm.slane %v305_v5, 1 }
  0x8d   : > { %477 = vmatpush.msra.mxu0 %v439_v21  ;;  %497 = vmatpush.msra.mxu1 %v440_v22 }
  0x8f   : > { %478 = vmatpush.msra.mxu0 %v421_v28  ;;  %498 = vmatpush.msra.mxu1 %v422_v29  ;;  %v635_v28 = vperm.slane %v836_v25, 1 }
  0x91   : > { %v374_v37 = vpop.permute.xlu1 %373  ;;  %479 = vmatpush.msra.mxu0 %v403_v31  ;;  %499 = vmatpush.msra.mxu1 %v404_v32  ;;  %v372_v38 = vpop.permute.xlu0 %371  ;;  %v618_v31 = vperm.slane %v835_v26, 0  ;;  %v619_v32 = vperm.slane %v835_v26, 1 }
  0x92   : > { %v376_v39 = vsel %vm375_vm3, %v372_v38, %v374_v37  ;;  %v377_v40 = vsel %vm375_vm3, %v374_v37, %v372_v38 }
  0x93   : > { %v385_v41 = vmul.f32 %v381_v33, %v376_v39  ;;  %v386_v42 = vmul.f32 %v382_v34, %v377_v40  ;;  %v834_v40 = vld [vmem:[%s1162_s1 + $0xc] sm:$0x3] }
  0x94   : > { %v602_v43 = vperm.slane %v834_v40, 0  ;;  %v603_v44 = vperm.slane %v834_v40, 1 }
  0x95   : > { %480 = vmatpush.msra.mxu0 %v385_v41  ;;  %500 = vmatpush.msra.mxu1 %v386_v42 }
  0x97   : > { %481 = vmatpush.msra.mxu0 %v935_v0  ;;  %501 = vmatpush.msra.mxu1 %v943_v1 }
  0x99   : > { %v334_v50 = vpop.permute.xlu1 %333  ;;  %v354_v51 = vpop.permute.xlu0 %353 }
  0x9a   : > { %v356_v52 = vsel %vm355_vm4, %v352_v30, %v354_v51  ;;  %v357_v53 = vsel %vm355_vm4, %v354_v51, %v352_v30  ;;  %v338_v54 = vsel %vm337_vm5, %v334_v50, %v336_v47  ;;  %v339_v55 = vsel %vm337_vm5, %v336_v47, %v334_v50 }
  0x9b   : > { %v365_v56 = vmul.f32 %v361_v45, %v357_v53  ;;  %v366_v57 = vmul.f32 %v362_v46, %v356_v52  ;;  %v347_v58 = vmul.f32 %v343_v48, %v339_v55  ;;  %v348_v59 = vmul.f32 %v344_v49, %v338_v54  ;;  %v293_v46 = vld [vmem:[%s1166_s5] sm:$0xff]  ;;  %v833_v52 = vld [vmem:[%s1162_s1 + $0xa] sm:$0x3] }
  0x9c   : > { %v586_v54 = vperm.slane %v833_v52, 0  ;;  %v587_v55 = vperm.slane %v833_v52, 1 }
  0x9d   : > { %482 = vmatpush.msra.mxu0 %v365_v56  ;;  %502 = vmatpush.msra.mxu1 %v366_v57  ;;  %v832_v57 = vld [vmem:[%s1162_s1 + $0x6] sm:$0x3] }
  0x9f   : > { %483 = vmatpush.msra.mxu0 %v347_v58  ;;  %503 = vmatpush.msra.mxu1 %v348_v59 }
  0xa1   : > { %v318_v63 = vpop.permute.xlu1 %317  ;;  %v316_v0 = vpop.permute.xlu0 %315 }
  0xa2   : > { %v320_v1 = vsel %vm319_vm6, %v316_v0, %v318_v63  ;;  %v321_v2 = vsel %vm319_vm6, %v318_v63, %v316_v0  ;;  %v568_v63 = vperm.slane %v832_v57, 0  ;;  %v569_v0 = vperm.slane %v832_v57, 1 }
  0xa3   : > { %v329_v3 = vmul.f32 %v325_v61, %v321_v2  ;;  %v330_v4 = vmul.f32 %v326_v62, %v320_v1 }
  0xa5   : > { %484 = vmatpush.msra.mxu0 %v329_v3  ;;  %504 = vmatpush.msra.mxu1 %v330_v4  ;;  %v831_v3 = vld [vmem:[%s1162_s1 + $0x4] sm:$0x3] }
  0xa9   : > { %v299_v10 = vpop.permute.xlu0 %298  ;;  %v464_v16 = vpop.permute.xlu1 %463 }
  0xaa   : > { %v303_v11 = vsel %vm302_vm7, %v297_v7, %v299_v10  ;;  %v304_v12 = vsel %vm302_vm7, %v299_v10, %v297_v7 }
  0xab   : > { %v311_v13 = vmul.f32 %v307_v8, %v304_v12  ;;  %v312_v14 = vmul.f32 %v308_v9, %v303_v11  ;;  %v552_v8 = vperm.slane %v831_v3, 0  ;;  %v553_v9 = vperm.slane %v831_v3, 1 }
  0xad   : > { %485 = vmatpush.msra.mxu0 %v311_v13  ;;  %505 = vmatpush.msra.mxu1 %v312_v14 }
  0xae   : > { %828 = vmatmul.msk.f32.vlgmr.msra.gmra.mxu0 %vm466_vm8, %v290_v15  ;;  %829 = vmatmul.msk.f32.vlgmr.msra.gmra.mxu1 %vm466_vm8, %v290_v15 }
 0x12b   : > { %v487_v17 = vpop.f32.mrf.mxu0  ;;  %v507_v18 = vpop.f32.mrf.mxu1 }
 0x12c   : > { %v488_v19 = vadd.f32 %v487_v17, %v464_v16  ;;  %v508_v20 = vadd.f32 %v507_v18, %v464_v16  ;;  %v830_v16 = vld [vmem:[%s1162_s1 + $0x2] sm:$0x3]  ;;  %v518_v17 = vld [vmem:[%s1162_s1] sm:$0x3] }
 0x12d   : > { %v536_v18 = vperm.slane %v830_v16, 0 }
 0x12e   : > { %v1047_v21 = vmax.f32 %v488_v19, 0.0  ;;  %v1049_v22 = vmax.f32 %v508_v20, 0.0  ;;  %v537_v19 = vperm.slane %v830_v16, 1 }
 0x130   : > { %610 = vrot.lane.b32.xlu1 %v1047_v21, %s870_s30  ;;  %626 = vrot.lane.b32.xlu2 %v1047_v21, %s871_s8 }
 0x131   : > { %628 = vrot.lane.b32.xlu0 %v1049_v22, %s871_s8 }
 0x138   : > { %596 = vrot.lane.b32.xlu1 %v1049_v22, %s872_s9  ;;  %612 = vrot.lane.b32.xlu2 %v1049_v22, %s870_s30 }
 0x139   : > { %594 = vrot.lane.b32.xlu0 %v1047_v21, %s872_s9  ;;  %s285_s9 = scalar_lea.vmem %s1167_s6, %s841_s26 }
 0x140   : > { %560 = vrot.lane.b32.xlu1 %v1047_v21, %s874_s11  ;;  %578 = vrot.lane.b32.xlu2 %v1047_v21, %s873_s10 }
 0x141   : > { %580 = vrot.lane.b32.xlu0 %v1049_v22, %s873_s10  ;;  %s820_s10 = sshll.u32 %s1170_s25, 3 }
 0x142   : > { %s289_s26 = scalar_lea.vmem %s1168_s7, %s820_s10 }
 0x148   : > { %546 = vrot.lane.b32.xlu1 %v1049_v22, %s875_s12  ;;  %562 = vrot.lane.b32.xlu2 %v1049_v22, %s874_s11 }
 0x149   : > { %544 = vrot.lane.b32.xlu0 %v1047_v21, %s875_s12 }
 0x150   : > { %512 = vrot.lane.b32.xlu1 %v1047_v21, %s877_s14  ;;  %528 = vrot.lane.b32.xlu2 %v1047_v21, %s876_s13 }
 0x151   : > { %530 = vrot.lane.b32.xlu0 %v1049_v22, %s876_s13 }
 0x158   : > { %514 = vrot.lane.b32.xlu2 %v1049_v22, %s877_s14 }
 0x159   : > { %662 = vperm.xlu0 %861, %v293_v46  }
 0x18a   : > { %v627_v23 = vpop.permute.xlu2 %626 }
 0x192   : > { %v613_v24 = vpop.permute.xlu2 %612 }
 0x19a   : > { %v579_v37 = vpop.permute.xlu2 %578 }
 0x1a2   : > { %v611_v29 = vpop.permute.xlu1 %610  ;;  %v563_v53 = vpop.permute.xlu2 %562 }
 0x1a3   : > { %v629_v30 = vpop.permute.xlu0 %628  ;;  %v614_v33 = vsel %vm411_vm0, %v611_v29, %v613_v24  ;;  %v615_v34 = vsel %vm411_vm0, %v613_v24, %v611_v29  ;;  %v521_v24 = vperm.slane %v518_v17, 1 }
 0x1a4   : > { %v630_v35 = vsel %vm429_vm1, %v627_v23, %v629_v30  ;;  %v631_v36 = vsel %vm429_vm1, %v629_v30, %v627_v23  ;;  %v622_v41 = vmul.f32 %v618_v31, %v614_v33  ;;  %v623_v42 = vmul.f32 %v619_v32, %v615_v34  ;;  %v291_v33 = vld [vmem:[%s1165_s4] sm:$0xff] }
 0x1a5   : > { %v638_v38 = vmul.f32 %v634_v27, %v630_v35  ;;  %v639_v39 = vmul.f32 %v635_v28, %v631_v36  ;;  %v520_v23 = vperm.slane %v518_v17, 0 }
 0x1a7   : > { %675 = vmatpush.msra.mxu2 %v638_v38  ;;  %695 = vmatpush.msra.mxu3 %v639_v39 }
 0x1a9   : > { %676 = vmatpush.msra.mxu2 %v622_v41  ;;  %696 = vmatpush.msra.mxu3 %v623_v42 }
 0x1aa   : > { %v597_v45 = vpop.permute.xlu1 %596  ;;  %v529_v4 = vpop.permute.xlu2 %528 }
 0x1ab   : > { %v595_v47 = vpop.permute.xlu0 %594 }
 0x1ac   : > { %v598_v48 = vsel %vm393_vm2, %v595_v47, %v597_v45  ;;  %v599_v49 = vsel %vm393_vm2, %v597_v45, %v595_v47 }
 0x1ad   : > { %v606_v50 = vmul.f32 %v602_v43, %v598_v48  ;;  %v607_v51 = vmul.f32 %v603_v44, %v599_v49 }
 0x1af   : > { %677 = vmatpush.msra.mxu2 %v606_v50  ;;  %697 = vmatpush.msra.mxu3 %v607_v51 }
 0x1b2   : > { %v561_v56 = vpop.permute.xlu1 %560 }
 0x1b3   : > { %v581_v58 = vpop.permute.xlu0 %580  ;;  %v564_v1 = vsel %vm355_vm4, %v561_v56, %v563_v53  ;;  %v565_v2 = vsel %vm355_vm4, %v563_v53, %v561_v56 }
 0x1b4   : > { %v582_v59 = vsel %vm375_vm3, %v579_v37, %v581_v58  ;;  %v583_v60 = vsel %vm375_vm3, %v581_v58, %v579_v37  ;;  %v572_v5 = vmul.f32 %v568_v63, %v565_v2  ;;  %v573_v7 = vmul.f32 %v569_v0, %v564_v1 }
 0x1b5   : > { %v590_v61 = vmul.f32 %v586_v54, %v582_v59  ;;  %v591_v62 = vmul.f32 %v587_v55, %v583_v60 }
 0x1b7   : > { %678 = vmatpush.msra.mxu2 %v590_v61  ;;  %698 = vmatpush.msra.mxu3 %v591_v62 }
 0x1b9   : > { %679 = vmatpush.msra.mxu2 %v1047_v21  ;;  %699 = vmatpush.msra.mxu3 %v1049_v22  ;;  %v515_v21 = vpop.permute.xlu2 %514 }
 0x1ba   : > { %v547_v10 = vpop.permute.xlu1 %546 }
 0x1bb   : > { %680 = vmatpush.msra.mxu2 %v572_v5  ;;  %700 = vmatpush.msra.mxu3 %v573_v7  ;;  %v545_v11 = vpop.permute.xlu0 %544 }
 0x1bc   : > { %v548_v12 = vsel %vm337_vm5, %v545_v11, %v547_v10  ;;  %v549_v13 = vsel %vm337_vm5, %v547_v10, %v545_v11 }
 0x1bd   : > { %v556_v14 = vmul.f32 %v552_v8, %v549_v13  ;;  %v557_v15 = vmul.f32 %v553_v9, %v548_v12 }
 0x1bf   : > { %681 = vmatpush.msra.mxu2 %v556_v14  ;;  %701 = vmatpush.msra.mxu3 %v557_v15 }
 0x1c2   : > { %v513_v20 = vpop.permute.xlu1 %512 }
 0x1c3   : > { %v531_v22 = vpop.permute.xlu0 %530  ;;  %v516_v25 = vsel %vm302_vm7, %v513_v20, %v515_v21  ;;  %v517_v26 = vsel %vm302_vm7, %v515_v21, %v513_v20 }
 0x1c4   : > { %v532_v27 = vsel %vm319_vm6, %v529_v4, %v531_v22  ;;  %v533_v28 = vsel %vm319_vm6, %v531_v22, %v529_v4  ;;  %v524_v31 = vmul.f32 %v520_v23, %v517_v26  ;;  %v525_v32 = vmul.f32 %v521_v24, %v516_v25 }
 0x1c5   : > { %v540_v29 = vmul.f32 %v536_v18, %v533_v28  ;;  %v541_v30 = vmul.f32 %v537_v19, %v532_v27 }
 0x1c7   : > { %682 = vmatpush.msra.mxu2 %v540_v29  ;;  %702 = vmatpush.msra.mxu3 %v541_v30 }
 0x1c9   : > { %683 = vmatpush.msra.mxu2 %v524_v31  ;;  %703 = vmatpush.msra.mxu3 %v525_v32 }
 0x1ca   : > { %837 = vmatmul.msk.f32.vlgmr.msra.gmra.mxu2 %vm466_vm8, %v291_v33  ;;  %838 = vmatmul.msk.f32.vlgmr.msra.gmra.mxu3 %vm466_vm8, %v291_v33 }
 0x1cb   : > { %v663_v34 = vpop.permute.xlu0 %662 }
 0x24d   : > { %v685_v6 = vpop.f32.mrf.mxu2  ;;  %v705_v35 = vpop.f32.mrf.mxu3 }
 0x24e   : > { %v686_v36 = vadd.f32 %v685_v6, %v663_v34  ;;  %v706_v37 = vadd.f32 %v705_v35, %v663_v34 }
 0x250   : > { %708 = vst [vmem:[%s285_s9] sm:$0xff] %v686_v36  ;;  %v710_v38 = vadd.f32 %v706_v37, %v686_v36 }
 0x251   : > { %709 = vst [vmem:[%s285_s9 + $0x8] sm:$0xff] %v706_v37 }
 0x252   : > { %711 = vadd.xlane.f32.xlu1 %v710_v38 }
 0x2c5   : > { %v712_v39 = vpop.xlane.xlu1 %711 }
 0x2c6   : > { %v713_v40 = vmul.f32 0.00390625, %v712_v39 }
 0x2c8   : > { %v714_v41 = vsub.f32 %v686_v36, %v713_v40  ;;  %v715_v42 = vsub.f32 %v706_v37, %v713_v40 }
 0x2ca   : > { %v716_v43 = vmul.f32 %v714_v41, %v714_v41  ;;  %v717_v44 = vmul.f32 %v715_v42, %v715_v42 }
 0x2cc   : > { %v718_v45 = vadd.f32 %v717_v44, %v716_v43 }
 0x2ce   : > { %719 = vadd.xlane.f32.xlu2 %v718_v45 }
 0x341   : > { %v720_v46 = vpop.xlane.xlu2 %719 }
 0x342   : > { %v722_v47 = vsel %vm721_vm9, %v712_v39, %v720_v46 }
 0x343   : > { %724 = vst.msk [vmem:[%s289_s26] sm:$0xff] %vm723_vm10, %v722_v47 }
 0x344 PF: > { %s18_s24 = sadd.s32 1, %s868_s24  }
 0x345   : > { %p15_p4 = scmp.ge.s32.totalorder %s18_s24, 4  }
 0x347   :  { %17 = sbr.rel (!%p15_p4) target bundleno = 1 (0x1), region = 93 }

</bundles_post_ra>
